<compile_context>
chip_gen: v5e
topology: v5e:2x2
jax: 0.10.0
libtpu: 0.0.40
codegen_flags: <defaults>
</compile_context>

<pallas_src>
import functools

import jax
import jax.numpy as jnp
from jax.experimental import pallas as pl
from jax.experimental.pallas import tpu as pltpu


def _round_up(x, m):
    return (x + m - 1) // m * m


# ------------------------------ Pallas kernel ------------------------------ #
def _gemm_kernel(x_ref, w_ref, o_ref):
    # x_ref: (tm, K) bf16, w_ref: (K, tn) bf16, o_ref: (tm, tn) f32
    o_ref[...] = jnp.dot(x_ref[...], w_ref[...],
                         preferred_element_type=jnp.float32)


def _gemm(x2d, w2d):
    """Pallas tiled matmul: (M, K) @ (K, Ncols) -> (M, Ncols) in f32.

    Operands are cast to bf16 (MXU-native); accumulation stays in f32.
    """
    M, K = x2d.shape
    K2, Ncols = w2d.shape
    assert K == K2

    # --- tile sizes --------------------------------------------------------
    # Rows: large tiles amortize the ~0.35us per-grid-step overhead.
    tm = 512 if M >= 512 else _round_up(M, 8)
    M_pad = _round_up(M, tm)
    # K (= in_c): single block (the convT contraction dim is modest).
    # TODO(synk): add a K grid axis + f32 scratch accumulator for very large in_c.
    K_pad = _round_up(K, 8)
    # Columns: multiple of 128 -> lane-dense, unmasked vector stores, full MXU cols.
    N_pad = _round_up(Ncols, 128)
    tn = N_pad if N_pad <= 512 else 512
    N_pad = _round_up(N_pad, tn)

    x_bf = x2d.astype(jnp.bfloat16)
    w_bf = w2d.astype(jnp.bfloat16)
    if (M_pad, K_pad) != (M, K):
        # LHS is only (M, in_c) -- padding it is cheap (no k^2 blow-up here).
        x_bf = jnp.pad(x_bf, ((0, M_pad - M), (0, K_pad - K)))
    if (K_pad, N_pad) != (K, Ncols):
        w_bf = jnp.pad(w_bf, ((0, K_pad - K), (0, N_pad - Ncols)))

    grid = (M_pad // tm, N_pad // tn)

    # VMEM budget: double-buffered in/out tiles; leave headroom for v7x (64 MiB).
    tile_bytes = 2 * (tm * K_pad * 2 + K_pad * tn * 2 + tm * tn * 4)
    vmem_limit = min(max(32 * 1024 * 1024, 2 * tile_bytes), 56 * 1024 * 1024)

    cost = pl.CostEstimate(
        flops=2 * M_pad * K_pad * N_pad,
        transcendentals=0,
        bytes_accessed=M_pad * K_pad * 2 + K_pad * N_pad * 2 + M_pad * N_pad * 4,
    )

    out = pl.pallas_call(
        _gemm_kernel,
        out_shape=jax.ShapeDtypeStruct((M_pad, N_pad), jnp.float32),
        grid_spec=pltpu.PrefetchScalarGridSpec(
            num_scalar_prefetch=0,
            grid=grid,
            in_specs=[
                pl.BlockSpec((tm, K_pad), lambda i, j: (i, 0)),
                pl.BlockSpec((K_pad, tn), lambda i, j: (0, j)),
            ],
            out_specs=pl.BlockSpec((tm, tn), lambda i, j: (i, j)),
        ),
        compiler_params=pltpu.CompilerParams(
            dimension_semantics=("parallel", "parallel"),
            vmem_limit_bytes=vmem_limit,
        ),
        cost_estimate=cost,
    )(x_bf, w_bf)
    return out[:M, :Ncols]


# -------------------------------- glue (JAX) -------------------------------- #
def _weight_norm_convT(v, g):
    """weight_norm(dim=0) for a ConvTranspose2d weight v: (in_c, out_c, k, k).

    w[i, ...] = g[i] * v[i, ...] / ||v[i, ...]||_2   (same as PyTorch: no epsilon).
    """
    norm = jnp.sqrt(jnp.sum(v * v, axis=(1, 2, 3), keepdims=True))
    return g.reshape(-1, 1, 1, 1) * v / norm


def conv_transpose_bn_forward(x_nchw, v, g, *, k, s):
    """ConvTransposeBn.forward.

    x_nchw: (N, in_c, H, W) f32
    v:      (in_c, out_c, k, k)  weight_norm direction (PyTorch ConvTranspose2d layout)
    g:      (in_c,)              weight_norm magnitude
    returns (N, out_c, (H-1)*s+k, (W-1)*s+k) f32, NCHW (PyTorch-facing).
    """
    N, in_c, H, W = x_nchw.shape
    in_c2, out_c, kh, kw = v.shape
    assert in_c == in_c2 and kh == k and kw == k

    w = _weight_norm_convT(v, g)                              # (in_c, out_c, k, k)
    # GEMM weight (in_c, k*k*out_c); column order = (dy, dx, oc).
    w2 = jnp.transpose(w, (0, 2, 3, 1)).reshape(in_c, k * k * out_c)

    # GEMM LHS: the raw input pixels, (N*H*W, in_c). (No im2col needed for convT.)
    x_flat = jnp.transpose(x_nchw, (0, 2, 3, 1)).reshape(N * H * W, in_c)

    cols = _gemm(x_flat, w2)                                  # (N*H*W, k*k*out_c) f32
    cols = cols.reshape(N, H, W, k, k, out_c)

    # col2im scatter-add: out[n, h*s+dy, w*s+dx, oc] += cols[n, h, w, dy, dx, oc]
    # TODO(synk): fuse col2im + ReLU into the Pallas kernel; overlapping output
    # regions between adjacent row tiles (when s < k) cannot be expressed with a
    # disjoint blocked out_spec, so the accumulation stays in XLA glue for now.
    OH = (H - 1) * s + k
    OW = (W - 1) * s + k
    out = jnp.zeros((N, OH, OW, out_c), jnp.float32)
    for dy in range(k):
        for dx in range(k):
            out = out.at[:, dy:dy + (H - 1) * s + 1:s,
                            dx:dx + (W - 1) * s + 1:s, :].add(cols[:, :, :, dy, dx, :])
    out = jnp.maximum(out, 0.0)                               # ReLU after accumulation
    return jnp.transpose(out, (0, 3, 1, 2))                   # NHWC -> NCHW


# ------------------------------ reference check ----------------------------- #
def _reference(x_nchw, v, g, *, k, s):
    """ConvTranspose2d(stride=s, padding=0) + ReLU via lhs-dilated conv (f32)."""
    w = _weight_norm_convT(v, g)                              # (in_c, out_c, k, k)
    # Transposed conv == dilated conv with spatially flipped, channel-swapped kernel.
    w_conv = jnp.transpose(w[:, :, ::-1, ::-1], (1, 0, 2, 3))  # (out_c, in_c, k, k)
    out = jax.lax.conv_general_dilated(
        x_nchw, w_conv,
        window_strides=(1, 1),
        padding=((k - 1, k - 1), (k - 1, k - 1)),
        lhs_dilation=(s, s),
        dimension_numbers=("NCHW", "OIHW", "NCHW"),
    )
    return jnp.maximum(out, 0.0)


if __name__ == "__main__":
    # ConvTransposeBn(in_c=4, out_c=8, k=3, s=2): upsamples 16x16 -> 33x33.
    key = jax.random.PRNGKey(0)
    kx, kv, kg = jax.random.split(key, 3)

    N, in_c, H, W = 2, 4, 16, 16
    out_c, k, s = 8, 3, 2

    x = jax.random.normal(kx, (N, in_c, H, W), dtype=jnp.float32)
    v = jax.random.normal(kv, (in_c, out_c, k, k), dtype=jnp.float32) * 0.1
    g = 1.0 + 0.05 * jax.random.normal(kg, (in_c,), dtype=jnp.float32)

    fwd = jax.jit(functools.partial(conv_transpose_bn_forward, k=k, s=s))
    y = fwd(x, v, g)
    jax.block_until_ready(y)

    OH, OW = (H - 1) * s + k, (W - 1) * s + k
    assert y.shape == (N, out_c, OH, OW), y.shape

    y_ref = _reference(x, v, g, k=k, s=s)
    # bf16 MXU operands -> slightly looser tolerance than a pure-f32 pipeline.
    max_err = float(jnp.max(jnp.abs(y - y_ref)))
    assert jnp.allclose(y, y_ref, atol=2e-2, rtol=2e-2), max_err

    print("KERNEL_OK")
</pallas_src>

<mosaic_0001>
module attributes {stable_mosaic.version = 11 : i64} {
  func.func @_gemm_kernel(%arg0: i32, %arg1: i32, %arg2: memref<512x8xbf16, #tpu.memory_space<vmem>>, %arg3: memref<8x128xbf16, #tpu.memory_space<vmem>>, %arg4: memref<512x128xf32, #tpu.memory_space<vmem>>) attributes {dimension_semantics = [#tpu.dimension_semantics<parallel>, #tpu.dimension_semantics<parallel>], iteration_bounds = array<i64: 1, 1>, scalar_prefetch = 0 : i64, scratch_operands = 0 : i64, tpu.core_type = #tpu.core_type<tc>, window_params = [{transform_indices = @transform_0, window_bounds = array<i64: 512, 8>}, {transform_indices = @transform_1, window_bounds = array<i64: 8, 128>}, {transform_indices = @transform_2, window_bounds = array<i64: 512, 128>}]} {
    %c0 = arith.constant 0 : index
    %c0_0 = arith.constant 0 : index
    %0 = vector.load %arg2[%c0, %c0_0] : memref<512x8xbf16, #tpu.memory_space<vmem>>, vector<512x8xbf16>
    %c0_1 = arith.constant 0 : index
    %c0_2 = arith.constant 0 : index
    %1 = vector.load %arg3[%c0_1, %c0_2] : memref<8x128xbf16, #tpu.memory_space<vmem>>, vector<8x128xbf16>
    %cst = arith.constant dense<0.000000e+00> : vector<512x128xf32>
    %2 = tpu.matmul %0, %1, %cst {dimension_numbers = #tpu.dot_dimension_numbers<[1], [0], [0], [1], [0, 0, 1, 1], [], []>} : vector<512x8xbf16>, vector<8x128xbf16>, vector<512x128xf32> -> vector<512x128xf32>
    %c0_3 = arith.constant 0 : index
    %c0_4 = arith.constant 0 : index
    %3 = vector.load %arg4[%c0_3, %c0_4] : memref<512x128xf32, #tpu.memory_space<vmem>>, vector<512x128xf32>
    tpu.vector_store %arg4[%c0_3, %c0_4], %2 {strides = array<i32>} : memref<512x128xf32, #tpu.memory_space<vmem>>, vector<512x128xf32>,
    return
  }
  func.func @transform_0(%arg0: i32, %arg1: i32) -> (i32, i32) {
    %c0_i32 = arith.constant 0 : i32
    %c0_i32_0 = arith.constant 0 : i32
    return %arg0, %c0_i32 : i32, i32
  }
  func.func @transform_1(%arg0: i32, %arg1: i32) -> (i32, i32) {
    %c0_i32 = arith.constant 0 : i32
    %c0_i32_0 = arith.constant 0 : i32
    return %c0_i32, %arg1 : i32, i32
  }
  func.func @transform_2(%arg0: i32, %arg1: i32) -> (i32, i32) {
    %c0_i32 = arith.constant 0 : i32
    return %arg0, %arg1 : i32, i32
  }
}

</mosaic_0001>

<bundles_post_ra>
// kernel: conv_transpose_bn_forward.1
= control target key start
LH: loop header
LB: loop body
LE: loop exit
PB: predicated region body
PF: predicated region fallthrough
CT: control target
= control target key end

     0   :  { %vm334_vm0 = vcmask 1043456   ;;  %vm237_vm1 = vcmask 64512   ;;  %s1108_s1 = inlined_call_operand.vmem [shape: bf16[8,128], index: 1, kind: input, shape index: {}]   ;;  %s1109_s0 = inlined_call_operand.vmem [shape: bf16[512,8], index: 0, kind: input, shape index: {}]   ;;  %s1110_s2 = inlined_call_operand.vmem [shape: f32[512,128], index: 2, kind: output, shape index: {}]  }
   0x1   :  { %v76_v0 = vld [vmem:[%s1108_s1] sm:$0xf]  ;;  %v736_v6 = vld [vmem:[%s1109_s0 + $0x8] sm:$0xff]  ;;  %v737_v10 = vld [vmem:[%s1109_s0 + $0x10] sm:$0xff] }
   0x2   :  { %v336_v1 = vsel %vm334_vm0, %v76_v0, 0  ;;  %v735_v2 = vld [vmem:[%s1109_s0] sm:$0xff]  ;;  %v744_v7 = vld [vmem:[%s1109_s0 + $0x48] sm:$0xff]  ;;  %v745_v11 = vld [vmem:[%s1109_s0 + $0x50] sm:$0xff] }
   0x3   :  { %v743_v3 = vld [vmem:[%s1109_s0 + $0x40] sm:$0xff]  ;;  %345 = vmatpush.bf16.msra.mxu0 %v336_v1  ;;  %767 = vmatpush.bf16.msra.mxu1 %v336_v1  ;;  %v752_v8 = vld [vmem:[%s1109_s0 + $0x88] sm:$0xff]  ;;  %v753_v12 = vld [vmem:[%s1109_s0 + $0x90] sm:$0xff] }
   0x4   :  { %v751_v4 = vld [vmem:[%s1109_s0 + $0x80] sm:$0xff]  ;;  %768 = vmatpush.bf16.msra.mxu2 %v336_v1  ;;  %769 = vmatpush.bf16.msra.mxu3 %v336_v1  ;;  %v760_v9 = vld [vmem:[%s1109_s0 + $0xc8] sm:$0xff]  ;;  %v761_v13 = vld [vmem:[%s1109_s0 + $0xd0] sm:$0xff] }
   0x5   :  { %v759_v5 = vld [vmem:[%s1109_s0 + $0xc0] sm:$0xff]  ;;  %v738_v14 = vld [vmem:[%s1109_s0 + $0x18] sm:$0xff]  ;;  %v740_v22 = vld [vmem:[%s1109_s0 + $0x28] sm:$0xff] }
   0x6   :  { %703 = vmatmul.msk.bf16.vlgmr.msra.gmra.mxu0 %vm237_vm1, %v735_v2  ;;  %711 = vmatmul.msk.bf16.vlgmr.msra.gmra.mxu1 %vm237_vm1, %v743_v3  ;;  %v746_v15 = vld [vmem:[%s1109_s0 + $0x58] sm:$0xff]  ;;  %v739_v18 = vld [vmem:[%s1109_s0 + $0x20] sm:$0xff]  ;;  %v748_v23 = vld [vmem:[%s1109_s0 + $0x68] sm:$0xff] }
   0x7   :  { %719 = vmatmul.msk.bf16.vlgmr.msra.gmra.mxu2 %vm237_vm1, %v751_v4  ;;  %727 = vmatmul.msk.bf16.vlgmr.msra.gmra.mxu3 %vm237_vm1, %v759_v5  ;;  %v754_v16 = vld [vmem:[%s1109_s0 + $0x98] sm:$0xff]  ;;  %v747_v19 = vld [vmem:[%s1109_s0 + $0x60] sm:$0xff]  ;;  %v756_v24 = vld [vmem:[%s1109_s0 + $0xa8] sm:$0xff] }
   0x8   :  { %v762_v17 = vld [vmem:[%s1109_s0 + $0xd8] sm:$0xff]  ;;  %v755_v20 = vld [vmem:[%s1109_s0 + $0xa0] sm:$0xff]  ;;  %v764_v25 = vld [vmem:[%s1109_s0 + $0xe8] sm:$0xff] }
   0x9   :  { %v763_v21 = vld [vmem:[%s1109_s0 + $0xe0] sm:$0xff]  ;;  %v741_v26 = vld [vmem:[%s1109_s0 + $0x30] sm:$0xff]  ;;  %v742_v30 = vld [vmem:[%s1109_s0 + $0x38] sm:$0xff] }
   0xa   :  { %v749_v27 = vld [vmem:[%s1109_s0 + $0x70] sm:$0xff]  ;;  %v750_v31 = vld [vmem:[%s1109_s0 + $0x78] sm:$0xff] }
   0xb   :  { %v757_v28 = vld [vmem:[%s1109_s0 + $0xb0] sm:$0xff]  ;;  %v758_v32 = vld [vmem:[%s1109_s0 + $0xb8] sm:$0xff] }
   0xc   :  { %v765_v29 = vld [vmem:[%s1109_s0 + $0xf0] sm:$0xff]  ;;  %v766_v33 = vld [vmem:[%s1109_s0 + $0xf8] sm:$0xff] }
  0x16   :  { %704 = vmatmul.msk.bf16.gmra.mxu0 %vm237_vm1, %v736_v6  ;;  %712 = vmatmul.msk.bf16.gmra.mxu1 %vm237_vm1, %v744_v7 }
  0x17   :  { %720 = vmatmul.msk.bf16.gmra.mxu2 %vm237_vm1, %v752_v8  ;;  %728 = vmatmul.msk.bf16.gmra.mxu3 %vm237_vm1, %v760_v9 }
  0x26   :  { %705 = vmatmul.msk.bf16.gmra.mxu0 %vm237_vm1, %v737_v10  ;;  %713 = vmatmul.msk.bf16.gmra.mxu1 %vm237_vm1, %v745_v11 }
  0x27   :  { %721 = vmatmul.msk.bf16.gmra.mxu2 %vm237_vm1, %v753_v12  ;;  %729 = vmatmul.msk.bf16.gmra.mxu3 %vm237_vm1, %v761_v13 }
  0x36   :  { %706 = vmatmul.msk.bf16.gmra.mxu0 %vm237_vm1, %v738_v14  ;;  %714 = vmatmul.msk.bf16.gmra.mxu1 %vm237_vm1, %v746_v15 }
  0x37   :  { %722 = vmatmul.msk.bf16.gmra.mxu2 %vm237_vm1, %v754_v16  ;;  %730 = vmatmul.msk.bf16.gmra.mxu3 %vm237_vm1, %v762_v17 }
  0x46   :  { %707 = vmatmul.msk.bf16.gmra.mxu0 %vm237_vm1, %v739_v18  ;;  %715 = vmatmul.msk.bf16.gmra.mxu1 %vm237_vm1, %v747_v19 }
  0x47   :  { %723 = vmatmul.msk.bf16.gmra.mxu2 %vm237_vm1, %v755_v20  ;;  %731 = vmatmul.msk.bf16.gmra.mxu3 %vm237_vm1, %v763_v21 }
  0x56   :  { %708 = vmatmul.msk.bf16.gmra.mxu0 %vm237_vm1, %v740_v22  ;;  %716 = vmatmul.msk.bf16.gmra.mxu1 %vm237_vm1, %v748_v23 }
  0x57   :  { %724 = vmatmul.msk.bf16.gmra.mxu2 %vm237_vm1, %v756_v24  ;;  %732 = vmatmul.msk.bf16.gmra.mxu3 %vm237_vm1, %v764_v25 }
  0x66   :  { %709 = vmatmul.msk.bf16.gmra.mxu0 %vm237_vm1, %v741_v26  ;;  %717 = vmatmul.msk.bf16.gmra.mxu1 %vm237_vm1, %v749_v27 }
  0x67   :  { %725 = vmatmul.msk.bf16.gmra.mxu2 %vm237_vm1, %v757_v28  ;;  %733 = vmatmul.msk.bf16.gmra.mxu3 %vm237_vm1, %v765_v29 }
  0x76   :  { %710 = vmatmul.msk.bf16.gmra.mxu0 %vm237_vm1, %v742_v30  ;;  %718 = vmatmul.msk.bf16.gmra.mxu1 %vm237_vm1, %v750_v31 }
  0x77   :  { %726 = vmatmul.msk.bf16.gmra.mxu2 %vm237_vm1, %v758_v32  ;;  %734 = vmatmul.msk.bf16.gmra.mxu3 %vm237_vm1, %v766_v33 }
  0x83   :  { %v347_v34 = vpop.f32.mrf.mxu0  ;;  %v387_v35 = vpop.f32.mrf.mxu1 }
  0x84   :  { %507 = vst [vmem:[%s1110_s2] sm:$0xff] %v347_v34 }
  0x85   :  { %523 = vst [vmem:[%s1110_s2 + $0x80] sm:$0xff] %v387_v35 }
  0x8a   :  { %v427_v36 = vpop.f32.mrf.mxu2  ;;  %v467_v37 = vpop.f32.mrf.mxu3 }
  0x8b   :  { %539 = vst [vmem:[%s1110_s2 + $0x100] sm:$0xff] %v427_v36  ;;  %v349_v38 = vpop.f32.mrf.mxu0  ;;  %v389_v39 = vpop.f32.mrf.mxu1 }
  0x8c   :  { %555 = vst [vmem:[%s1110_s2 + $0x180] sm:$0xff] %v467_v37 }
  0x8d   :  { %508 = vst [vmem:[%s1110_s2 + $0x8] sm:$0xff] %v349_v38 }
  0x8e   :  { %524 = vst [vmem:[%s1110_s2 + $0x88] sm:$0xff] %v389_v39 }
  0x92   :  { %v429_v40 = vpop.f32.mrf.mxu2  ;;  %v469_v41 = vpop.f32.mrf.mxu3 }
  0x93   :  { %540 = vst [vmem:[%s1110_s2 + $0x108] sm:$0xff] %v429_v40  ;;  %v352_v42 = vpop.f32.mrf.mxu0  ;;  %v392_v43 = vpop.f32.mrf.mxu1 }
  0x94   :  { %556 = vst [vmem:[%s1110_s2 + $0x188] sm:$0xff] %v469_v41 }
  0x95   :  { %509 = vst [vmem:[%s1110_s2 + $0x10] sm:$0xff] %v352_v42 }
  0x96   :  { %525 = vst [vmem:[%s1110_s2 + $0x90] sm:$0xff] %v392_v43 }
  0x9a   :  { %v432_v44 = vpop.f32.mrf.mxu2  ;;  %v472_v45 = vpop.f32.mrf.mxu3 }
  0x9b   :  { %541 = vst [vmem:[%s1110_s2 + $0x110] sm:$0xff] %v432_v44  ;;  %v354_v46 = vpop.f32.mrf.mxu0  ;;  %v394_v47 = vpop.f32.mrf.mxu1 }
  0x9c   :  { %557 = vst [vmem:[%s1110_s2 + $0x190] sm:$0xff] %v472_v45 }
  0x9d   :  { %510 = vst [vmem:[%s1110_s2 + $0x18] sm:$0xff] %v354_v46 }
  0x9e   :  { %526 = vst [vmem:[%s1110_s2 + $0x98] sm:$0xff] %v394_v47 }
  0xa2   :  { %v434_v48 = vpop.f32.mrf.mxu2  ;;  %v474_v49 = vpop.f32.mrf.mxu3 }
  0xa3   :  { %542 = vst [vmem:[%s1110_s2 + $0x118] sm:$0xff] %v434_v48  ;;  %v357_v50 = vpop.f32.mrf.mxu0  ;;  %v397_v51 = vpop.f32.mrf.mxu1 }
  0xa4   :  { %558 = vst [vmem:[%s1110_s2 + $0x198] sm:$0xff] %v474_v49 }
  0xa5   :  { %511 = vst [vmem:[%s1110_s2 + $0x20] sm:$0xff] %v357_v50 }
  0xa6   :  { %527 = vst [vmem:[%s1110_s2 + $0xa0] sm:$0xff] %v397_v51 }
  0xaa   :  { %v437_v52 = vpop.f32.mrf.mxu2  ;;  %v477_v53 = vpop.f32.mrf.mxu3 }
  0xab   :  { %543 = vst [vmem:[%s1110_s2 + $0x120] sm:$0xff] %v437_v52  ;;  %v359_v54 = vpop.f32.mrf.mxu0  ;;  %v399_v55 = vpop.f32.mrf.mxu1 }
  0xac   :  { %559 = vst [vmem:[%s1110_s2 + $0x1a0] sm:$0xff] %v477_v53 }
  0xad   :  { %512 = vst [vmem:[%s1110_s2 + $0x28] sm:$0xff] %v359_v54 }
  0xae   :  { %528 = vst [vmem:[%s1110_s2 + $0xa8] sm:$0xff] %v399_v55 }
  0xb2   :  { %v439_v56 = vpop.f32.mrf.mxu2  ;;  %v479_v57 = vpop.f32.mrf.mxu3 }
  0xb3   :  { %544 = vst [vmem:[%s1110_s2 + $0x128] sm:$0xff] %v439_v56  ;;  %v362_v58 = vpop.f32.mrf.mxu0  ;;  %v402_v59 = vpop.f32.mrf.mxu1 }
  0xb4   :  { %560 = vst [vmem:[%s1110_s2 + $0x1a8] sm:$0xff] %v479_v57 }
  0xb5   :  { %513 = vst [vmem:[%s1110_s2 + $0x30] sm:$0xff] %v362_v58 }
  0xb6   :  { %529 = vst [vmem:[%s1110_s2 + $0xb0] sm:$0xff] %v402_v59 }
  0xba   :  { %v442_v60 = vpop.f32.mrf.mxu2  ;;  %v482_v61 = vpop.f32.mrf.mxu3 }
  0xbb   :  { %545 = vst [vmem:[%s1110_s2 + $0x130] sm:$0xff] %v442_v60  ;;  %v364_v62 = vpop.f32.mrf.mxu0  ;;  %v404_v63 = vpop.f32.mrf.mxu1 }
  0xbc   :  { %561 = vst [vmem:[%s1110_s2 + $0x1b0] sm:$0xff] %v482_v61 }
  0xbd   :  { %514 = vst [vmem:[%s1110_s2 + $0x38] sm:$0xff] %v364_v62 }
  0xbe   :  { %530 = vst [vmem:[%s1110_s2 + $0xb8] sm:$0xff] %v404_v63 }
  0xc2   :  { %v444_v0 = vpop.f32.mrf.mxu2  ;;  %v484_v1 = vpop.f32.mrf.mxu3 }
  0xc3   :  { %546 = vst [vmem:[%s1110_s2 + $0x138] sm:$0xff] %v444_v0  ;;  %v367_v2 = vpop.f32.mrf.mxu0  ;;  %v407_v3 = vpop.f32.mrf.mxu1 }
  0xc4   :  { %562 = vst [vmem:[%s1110_s2 + $0x1b8] sm:$0xff] %v484_v1 }
  0xc5   :  { %515 = vst [vmem:[%s1110_s2 + $0x40] sm:$0xff] %v367_v2 }
  0xc6   :  { %531 = vst [vmem:[%s1110_s2 + $0xc0] sm:$0xff] %v407_v3 }
  0xca   :  { %v447_v4 = vpop.f32.mrf.mxu2  ;;  %v487_v5 = vpop.f32.mrf.mxu3 }
  0xcb   :  { %547 = vst [vmem:[%s1110_s2 + $0x140] sm:$0xff] %v447_v4  ;;  %v369_v6 = vpop.f32.mrf.mxu0  ;;  %v409_v7 = vpop.f32.mrf.mxu1 }
  0xcc   :  { %563 = vst [vmem:[%s1110_s2 + $0x1c0] sm:$0xff] %v487_v5 }
  0xcd   :  { %516 = vst [vmem:[%s1110_s2 + $0x48] sm:$0xff] %v369_v6 }
  0xce   :  { %532 = vst [vmem:[%s1110_s2 + $0xc8] sm:$0xff] %v409_v7 }
  0xd2   :  { %v449_v8 = vpop.f32.mrf.mxu2  ;;  %v489_v9 = vpop.f32.mrf.mxu3 }
  0xd3   :  { %548 = vst [vmem:[%s1110_s2 + $0x148] sm:$0xff] %v449_v8  ;;  %v372_v10 = vpop.f32.mrf.mxu0  ;;  %v412_v11 = vpop.f32.mrf.mxu1 }
  0xd4   :  { %564 = vst [vmem:[%s1110_s2 + $0x1c8] sm:$0xff] %v489_v9 }
  0xd5   :  { %517 = vst [vmem:[%s1110_s2 + $0x50] sm:$0xff] %v372_v10 }
  0xd6   :  { %533 = vst [vmem:[%s1110_s2 + $0xd0] sm:$0xff] %v412_v11 }
  0xda   :  { %v452_v12 = vpop.f32.mrf.mxu2  ;;  %v492_v13 = vpop.f32.mrf.mxu3 }
  0xdb   :  { %549 = vst [vmem:[%s1110_s2 + $0x150] sm:$0xff] %v452_v12  ;;  %v374_v14 = vpop.f32.mrf.mxu0  ;;  %v414_v15 = vpop.f32.mrf.mxu1 }
  0xdc   :  { %565 = vst [vmem:[%s1110_s2 + $0x1d0] sm:$0xff] %v492_v13 }
  0xdd   :  { %518 = vst [vmem:[%s1110_s2 + $0x58] sm:$0xff] %v374_v14 }
  0xde   :  { %534 = vst [vmem:[%s1110_s2 + $0xd8] sm:$0xff] %v414_v15 }
  0xe2   :  { %v454_v16 = vpop.f32.mrf.mxu2  ;;  %v494_v17 = vpop.f32.mrf.mxu3 }
  0xe3   :  { %550 = vst [vmem:[%s1110_s2 + $0x158] sm:$0xff] %v454_v16  ;;  %v377_v18 = vpop.f32.mrf.mxu0  ;;  %v417_v19 = vpop.f32.mrf.mxu1 }
  0xe4   :  { %566 = vst [vmem:[%s1110_s2 + $0x1d8] sm:$0xff] %v494_v17 }
  0xe5   :  { %519 = vst [vmem:[%s1110_s2 + $0x60] sm:$0xff] %v377_v18 }
  0xe6   :  { %535 = vst [vmem:[%s1110_s2 + $0xe0] sm:$0xff] %v417_v19 }
  0xea   :  { %v457_v20 = vpop.f32.mrf.mxu2  ;;  %v497_v21 = vpop.f32.mrf.mxu3 }
  0xeb   :  { %551 = vst [vmem:[%s1110_s2 + $0x160] sm:$0xff] %v457_v20  ;;  %v379_v22 = vpop.f32.mrf.mxu0  ;;  %v419_v23 = vpop.f32.mrf.mxu1 }
  0xec   :  { %567 = vst [vmem:[%s1110_s2 + $0x1e0] sm:$0xff] %v497_v21 }
  0xed   :  { %520 = vst [vmem:[%s1110_s2 + $0x68] sm:$0xff] %v379_v22 }
  0xee   :  { %536 = vst [vmem:[%s1110_s2 + $0xe8] sm:$0xff] %v419_v23 }
  0xf2   :  { %v459_v24 = vpop.f32.mrf.mxu2  ;;  %v499_v25 = vpop.f32.mrf.mxu3 }
  0xf3   :  { %552 = vst [vmem:[%s1110_s2 + $0x168] sm:$0xff] %v459_v24  ;;  %v382_v26 = vpop.f32.mrf.mxu0  ;;  %v422_v27 = vpop.f32.mrf.mxu1 }
  0xf4   :  { %568 = vst [vmem:[%s1110_s2 + $0x1e8] sm:$0xff] %v499_v25 }
  0xf5   :  { %521 = vst [vmem:[%s1110_s2 + $0x70] sm:$0xff] %v382_v26 }
  0xf6   :  { %537 = vst [vmem:[%s1110_s2 + $0xf0] sm:$0xff] %v422_v27 }
  0xfa   :  { %v462_v28 = vpop.f32.mrf.mxu2  ;;  %v502_v29 = vpop.f32.mrf.mxu3 }
  0xfb   :  { %553 = vst [vmem:[%s1110_s2 + $0x170] sm:$0xff] %v462_v28  ;;  %v384_v30 = vpop.f32.mrf.mxu0  ;;  %v424_v31 = vpop.f32.mrf.mxu1 }
  0xfc   :  { %569 = vst [vmem:[%s1110_s2 + $0x1f0] sm:$0xff] %v502_v29 }
  0xfd   :  { %522 = vst [vmem:[%s1110_s2 + $0x78] sm:$0xff] %v384_v30 }
  0xfe   :  { %538 = vst [vmem:[%s1110_s2 + $0xf8] sm:$0xff] %v424_v31 }
 0x102   :  { %v464_v32 = vpop.f32.mrf.mxu2  ;;  %v504_v33 = vpop.f32.mrf.mxu3 }
 0x103   :  { %554 = vst [vmem:[%s1110_s2 + $0x178] sm:$0xff] %v464_v32 }
 0x104   :  { %570 = vst [vmem:[%s1110_s2 + $0x1f8] sm:$0xff] %v504_v33 }

</bundles_post_ra>
